<compile_context>
chip_gen: v7x
topology: tpu7x:2x2x1
jax: 0.10.0
libtpu: 0.0.40
codegen_flags: <defaults>
</compile_context>

<pallas_src>
import functools

import jax
import jax.numpy as jnp
from jax.experimental import pallas as pl
from jax.experimental.pallas import tpu as pltpu

GCN_DROPOUT = 0.3  # unused at inference
LANE = 128


def _round_up(x, m):
    return (x + m - 1) // m * m


def _tpu_vmem_capacity_bytes():
    """Physical VMEM per TensorCore; conservative fallback if the query fails."""
    try:
        return int(pltpu.get_tpu_info().vmem_capacity_bytes)
    except Exception:
        return 64 * 1024 * 1024  # safe on every generation (v7x has 64 MiB)


def _tpu_num_tensorcores():
    """TensorCores one Pallas grid can shard 'parallel' axes across."""
    try:
        kind = jax.devices()[0].device_kind.lower()
    except Exception:
        return 1
    if "v7" in kind or "7x" in kind or "v5p" in kind or "v4" in kind:
        return 2
    return 1


def _tpu_mxu_n():
    """MXU tile width (only used to decide extra output-feature padding)."""
    try:
        kind = jax.devices()[0].device_kind.lower()
    except Exception:
        return 128
    return 256 if ("v6" in kind or "v7" in kind or "7x" in kind) else 128


def _vmem_bytes(bb, s_p, d, m, mp, d_ins):
    """Conservative per-step VMEM estimate: double-buffered pipeline tiles +
    resident (double-buffered) weights/biases + in-kernel f32 intermediates
    (adj cast, ax, ax+h, axw, h), all with (8,128) layout padding."""
    r8 = lambda v: _round_up(v, 8)
    rl = lambda v: _round_up(v, LANE)
    adj_tile = bb * r8(s_p) * rl(s_p) * 2          # bf16
    x_tile = bb * r8(s_p) * rl(d) * 4
    out_tile = bb * r8(s_p) * rl(m) * 4
    tiles = 2 * (adj_tile + x_tile + out_tile)     # double-buffered by Pallas
    wb = sum(2 * (r8(d_in) * mp + 8 * mp) * 4 for d_in in d_ins)
    feat = max(rl(d), mp)
    inter = bb * r8(s_p) * rl(s_p) * 4 + 4 * bb * r8(s_p) * feat * 4
    return tiles + wb + inter


def _pick_block_b(b, s_p, d, m, mp, d_ins, vmem_cap, num_tc):
    """Largest per-step batch block that (a) fits ~40% of physical VMEM
    (headroom for Mosaic scratch / spills) and (b) keeps grid >= num_tc so
    every TensorCore gets work on 2-TC chips. B need not be divisible by the
    block: the wrapper zero-pads the batch."""
    budget = int(vmem_cap * 0.40)
    bb_vmem = 1
    for cand in range(1, b + 1):
        if _vmem_bytes(cand, s_p, d, m, mp, d_ins) <= budget:
            bb_vmem = cand
        else:
            break  # estimate is monotone in bb
    bb_tc = -(-b // num_tc) if (num_tc >= 2 and b >= 2) else b
    bb = max(1, min(bb_vmem, bb_tc, b))
    grid_n = -(-b // bb)
    bb = -(-b // grid_n)          # shrink block to minimize batch padding
    return bb, grid_n


def _gcn_kernel(num_layers, adj_ref, x_ref, *rest):
    """One grid step == Bb batch elements; all layers fused in VMEM.
    Assumes every layer's full (d_in, Mp) weight + per-layer intermediates fit
    in VMEM (no K/N tiling fallback) -- fails loudly at compile time if not."""
    wb_refs = rest[: 2 * num_layers]          # W0, 2*b0, W1, 2*b1, ...
    out_ref = rest[2 * num_layers]

    adj = adj_ref[...].astype(jnp.float32)    # bf16 (exact 0/1) -> f32
    h = x_ref[...].astype(jnp.float32)        # (Bb, S, D)
    bb, s, _ = adj.shape

    # denom = adj.sum(2) + 1 ; reciprocal hoisted out of the layer loop.
    inv_denom = 1.0 / (jnp.sum(adj, axis=-1, keepdims=True) + 1.0)   # (Bb, S, 1)

    for l in range(num_layers):
        w = wb_refs[2 * l][...]               # (d_in_p, Mp)
        b2 = wb_refs[2 * l + 1][...]          # (1, Mp) == 2 * bias (zero-padded)

        # Ax = adj @ h  (batched, binary adjacency)
        ax = jnp.einsum("bij,bjd->bid", adj, h,
                        preferred_element_type=jnp.float32)

        # Fused: Linear(Ax) + Linear(h) = (Ax + h) @ W + 2*b  -> 2 matmuls/layer
        s2d = (ax + h).reshape(bb * s, -1)    # S is a multiple of 8 -> free reshape
        axw = jnp.dot(s2d, w, preferred_element_type=jnp.float32) + b2
        h = jnp.maximum(axw.reshape(bb, s, -1) * inv_denom, 0.0)    # ReLU
        # in_drop / gcn_drop are identity at inference

    m = out_ref.shape[-1]
    out = h if h.shape[-1] == m else h[..., :m]
    out_ref[...] = out.astype(out_ref.dtype)


def gcn_forward(adj, token_encode, weights, biases):
    """
    adj:          (B, S, S) float32 (dependency graph, 0/1 entries)
    token_encode: (B, S, D) float32
    weights:      list of (D_in_l, M) float32  (torch weight transposed)
    biases:       list of (1, M) float32
    returns:      gcn_out (B, S, M) float32, mask (B, S, 1) bool
    """
    B, S, _ = adj.shape
    D = token_encode.shape[-1]
    M = weights[0].shape[-1]
    num_layers = len(weights)

    # mask: two tiny reductions independent of the layers -> keep in the wrapper.
    mask = ((adj.sum(axis=2) + adj.sum(axis=1)) == 0.0)[..., None]

    # Pad output features to a lane multiple (full MXU columns); when M already
    # exceeds one lane, pad to the chip's MXU tile width instead.
    Mp = _round_up(M, LANE) if M <= LANE else _round_up(M, _tpu_mxu_n())
    d_ins = [D] + [Mp] * (num_layers - 1)

    # Pad S to a sublane multiple so the in-kernel (Bb,S,F)<->(Bb*S,F) reshapes
    # are layout-preserving (no VMEM copies).
    S_p = _round_up(S, 8)

    vmem_cap = _tpu_vmem_capacity_bytes()
    num_tc = _tpu_num_tensorcores()
    Bb, grid_n = _pick_block_b(B, S_p, D, M, Mp, d_ins, vmem_cap, num_tc)
    B_pad = Bb * grid_n

    # adj is binary -> exact in bf16; halves its HBM stream + VMEM footprint.
    # TODO(synk): keep adj in f32 if weighted (non 0/1) adjacencies are needed.
    if (B_pad, S_p) != (B, S):
        adj_k = jnp.zeros((B_pad, S_p, S_p), jnp.bfloat16)
        adj_k = adj_k.at[:B, :S, :S].set(adj.astype(jnp.bfloat16))
        x_k = jnp.zeros((B_pad, S_p, D), token_encode.dtype)
        x_k = x_k.at[:B, :S, :].set(token_encode)
    else:
        adj_k = adj.astype(jnp.bfloat16)
        x_k = token_encode

    # Zero-pad weights/biases to Mp columns (zero bias cols stay zero through
    # ReLU; zero weight rows hit only those zero columns -> numerically
    # transparent) and fold the fused "+ 2*bias" into the bias tensor.
    wb, wb_specs = [], []
    for l, (w, b) in enumerate(zip(weights, biases)):
        d_in = D if l == 0 else M
        d_in_p = d_ins[l]
        w_p = jnp.zeros((d_in_p, Mp), jnp.float32).at[:d_in, :M].set(w)
        b_p = jnp.zeros((1, Mp), jnp.float32).at[:, :M].set(2.0 * b)
        wb.append(w_p)
        wb_specs.append(pl.BlockSpec(w_p.shape, lambda i: (0, 0)))
        wb.append(b_p)
        wb_specs.append(pl.BlockSpec(b_p.shape, lambda i: (0, 0)))

    # Scoped VMEM limit matching the budget used to pick Bb (defaults are
    # 16 MiB on v5e / 32 MiB on v6e & v7x -- far below 40% of physical).
    est = _vmem_bytes(Bb, S_p, D, M, Mp, d_ins)
    vmem_limit = max(int(vmem_cap * 0.75), min(est + (8 << 20), vmem_cap))
    vmem_limit = min(vmem_limit, vmem_cap)

    flops = sum(2 * B_pad * S_p * S_p * d + 2 * B_pad * S_p * d * Mp
                for d in d_ins)
    bytes_accessed = (adj_k.size * 2 + x_k.size * 4 + B_pad * S_p * M * 4
                      + sum(int(a.size) * 4 for a in wb))

    kernel = functools.partial(_gcn_kernel, num_layers)

    out_p = pl.pallas_call(
        kernel,
        out_shape=jax.ShapeDtypeStruct((B_pad, S_p, M), jnp.float32),
        grid_spec=pltpu.PrefetchScalarGridSpec(
            num_scalar_prefetch=0,
            grid=(grid_n,),
            in_specs=[
                pl.BlockSpec((Bb, S_p, S_p), lambda i: (i, 0, 0)),   # adj (bf16)
                pl.BlockSpec((Bb, S_p, D), lambda i: (i, 0, 0)),     # token_encode
            ] + wb_specs,
            out_specs=pl.BlockSpec((Bb, S_p, M), lambda i: (i, 0, 0)),
        ),
        compiler_params=pltpu.CompilerParams(
            dimension_semantics=("parallel",),
            vmem_limit_bytes=int(vmem_limit)),
        cost_estimate=pl.CostEstimate(
            flops=int(flops), transcendentals=0,
            bytes_accessed=int(bytes_accessed)),
    )(adj_k, x_k, *wb)

    out = out_p if (B_pad, S_p) == (B, S) else out_p[:B, :S, :]
    return out, mask


def init_params(key, in_dim, mem_dim, num_layers):
    weights, biases = [], []
    for l in range(num_layers):
        d_in = in_dim if l == 0 else mem_dim
        key, kw, kb = jax.random.split(key, 3)
        bound = 1.0 / jnp.sqrt(d_in)
        # stored as (d_in, mem_dim) == torch weight.T
        weights.append(jax.random.uniform(kw, (d_in, mem_dim), jnp.float32,
                                          minval=-bound, maxval=bound))
        biases.append(jax.random.uniform(kb, (1, mem_dim), jnp.float32,
                                         minval=-bound, maxval=bound))
    return weights, biases


if __name__ == "__main__":
    B, S, IN_DIM, MEM_DIM, NUM_LAYERS = 2, 8, 32, 32, 2

    key = jax.random.PRNGKey(0)
    k_adj, k_x, k_p = jax.random.split(key, 3)

    # sparse-ish binary adjacency (some rows/cols fully zero -> exercises mask)
    adj = (jax.random.uniform(k_adj, (B, S, S)) > 0.7).astype(jnp.float32)
    adj = adj.at[:, S - 1, :].set(0.0).at[:, :, S - 1].set(0.0)  # isolate last token
    token_encode = jax.random.normal(k_x, (B, S, IN_DIM), jnp.float32)

    weights, biases = init_params(k_p, IN_DIM, MEM_DIM, NUM_LAYERS)

    out, mask = gcn_forward(adj, token_encode, weights, biases)
    jax.block_until_ready((out, mask))

    # quick sanity check against pure-JAX reference
    def ref(adj, x, weights, biases):
        denom = adj.sum(2)[..., None] + 1.0
        msk = ((adj.sum(2) + adj.sum(1)) == 0)[..., None]
        h = x
        for w, b in zip(weights, biases):
            ax = jnp.einsum("bij,bjd->bid", adj, h)
            axw = (ax @ w + b) + (h @ w + b)
            h = jax.nn.relu(axw / denom)
        return h, msk

    out_ref, mask_ref = ref(adj, token_encode, weights, biases)
    assert out.shape == (B, S, MEM_DIM) and mask.shape == (B, S, 1)
    assert jnp.allclose(out, out_ref, atol=1e-4, rtol=1e-4), "output mismatch"
    assert jnp.array_equal(mask, mask_ref), "mask mismatch"

    print("KERNEL_OK")
</pallas_src>

<mosaic_0001>
module attributes {stable_mosaic.version = 11 : i64} {
  func.func @_gcn_kernel(%arg0: i32, %arg1: memref<2x8x8xbf16, #tpu.memory_space<vmem>>, %arg2: memref<2x8x32xf32, #tpu.memory_space<vmem>>, %arg3: memref<32x128xf32, #tpu.memory_space<vmem>>, %arg4: memref<1x128xf32, #tpu.memory_space<vmem>>, %arg5: memref<128x128xf32, #tpu.memory_space<vmem>>, %arg6: memref<1x128xf32, #tpu.memory_space<vmem>>, %arg7: memref<2x8x32xf32, #tpu.memory_space<vmem>>) attributes {dimension_semantics = [#tpu.dimension_semantics<parallel>], iteration_bounds = array<i64: 1>, scalar_prefetch = 0 : i64, scratch_operands = 0 : i64, tpu.core_type = #tpu.core_type<tc>, window_params = [{transform_indices = @transform_0, window_bounds = array<i64: 2, 8, 8>}, {transform_indices = @transform_1, window_bounds = array<i64: 2, 8, 32>}, {pipeline_mode = #tpu.pipeline_mode<synchronous>, transform_indices = @transform_2, window_bounds = array<i64: 32, 128>}, {pipeline_mode = #tpu.pipeline_mode<synchronous>, transform_indices = @transform_3, window_bounds = array<i64: 1, 128>}, {pipeline_mode = #tpu.pipeline_mode<synchronous>, transform_indices = @transform_4, window_bounds = array<i64: 128, 128>}, {pipeline_mode = #tpu.pipeline_mode<synchronous>, transform_indices = @transform_5, window_bounds = array<i64: 1, 128>}, {transform_indices = @transform_6, window_bounds = array<i64: 2, 8, 32>}]} {
    %c0 = arith.constant 0 : index
    %c0_0 = arith.constant 0 : index
    %c0_1 = arith.constant 0 : index
    %0 = vector.load %arg1[%c0, %c0_0, %c0_1] : memref<2x8x8xbf16, #tpu.memory_space<vmem>>, vector<2x8x8xbf16>
    %1 = arith.extf %0 : vector<2x8x8xbf16> to vector<2x8x8xf32>
    %c0_2 = arith.constant 0 : index
    %c0_3 = arith.constant 0 : index
    %c0_4 = arith.constant 0 : index
    %2 = vector.load %arg2[%c0_2, %c0_3, %c0_4] : memref<2x8x32xf32, #tpu.memory_space<vmem>>, vector<2x8x32xf32>
    %cst = arith.constant dense<0.000000e+00> : vector<2x8xf32>
    %3 = vector.multi_reduction <add>, %1, %cst [2] : vector<2x8x8xf32> to vector<2x8xf32>
    %4 = vector.shape_cast %3 : vector<2x8xf32> to vector<2x8x1xf32>
    %cst_5 = arith.constant 1.000000e+00 : f32
    %5 = vector.broadcast %cst_5 : f32 to vector<2x8x1xf32>
    %6 = arith.addf %4, %5 : vector<2x8x1xf32>
    %cst_6 = arith.constant 1.000000e+00 : f32
    %7 = vector.broadcast %cst_6 : f32 to vector<2x8x1xf32>
    %8 = arith.divf %7, %6 : vector<2x8x1xf32>
    %c0_7 = arith.constant 0 : index
    %c0_8 = arith.constant 0 : index
    %9 = vector.load %arg3[%c0_7, %c0_8] : memref<32x128xf32, #tpu.memory_space<vmem>>, vector<32x128xf32>
    %c0_9 = arith.constant 0 : index
    %c0_10 = arith.constant 0 : index
    %10 = vector.load %arg4[%c0_9, %c0_10] : memref<1x128xf32, #tpu.memory_space<vmem>>, vector<1x128xf32>
    "tpu.trace_start"() <{level = 10 : i32, message = "bij,bjd->bid"}> : () -> ()
    %cst_11 = arith.constant dense<0.000000e+00> : vector<2x8x32xf32>
    %11 = tpu.matmul %1, %2, %cst_11 {dimension_numbers = #tpu.dot_dimension_numbers<[2], [1], [1], [2], [0, 0, 0, 1, 1, 2], [0], [0]>} : vector<2x8x8xf32>, vector<2x8x32xf32>, vector<2x8x32xf32> -> vector<2x8x32xf32>
    "tpu.trace_stop"() : () -> ()
    %12 = arith.addf %11, %2 : vector<2x8x32xf32>
    %13 = vector.shape_cast %12 : vector<2x8x32xf32> to vector<16x32xf32>
    %cst_12 = arith.constant dense<0.000000e+00> : vector<16x128xf32>
    %14 = tpu.matmul %13, %9, %cst_12 {dimension_numbers = #tpu.dot_dimension_numbers<[1], [0], [0], [1], [0, 0, 1, 1], [], []>} : vector<16x32xf32>, vector<32x128xf32>, vector<16x128xf32> -> vector<16x128xf32>
    %15 = vector.broadcast %10 : vector<1x128xf32> to vector<16x128xf32>
    %16 = arith.addf %14, %15 : vector<16x128xf32>
    %17 = vector.shape_cast %16 : vector<16x128xf32> to vector<2x8x128xf32>
    %18 = vector.broadcast %8 : vector<2x8x1xf32> to vector<2x8x128xf32>
    %19 = arith.mulf %17, %18 : vector<2x8x128xf32>
    %cst_13 = arith.constant 0.000000e+00 : f32
    %20 = vector.broadcast %cst_13 : f32 to vector<2x8x128xf32>
    %21 = arith.maximumf %19, %20 : vector<2x8x128xf32>
    %c0_14 = arith.constant 0 : index
    %c0_15 = arith.constant 0 : index
    %22 = vector.load %arg5[%c0_14, %c0_15] : memref<128x128xf32, #tpu.memory_space<vmem>>, vector<128x128xf32>
    %c0_16 = arith.constant 0 : index
    %c0_17 = arith.constant 0 : index
    %23 = vector.load %arg6[%c0_16, %c0_17] : memref<1x128xf32, #tpu.memory_space<vmem>>, vector<1x128xf32>
    "tpu.trace_start"() <{level = 10 : i32, message = "bij,bjd->bid"}> : () -> ()
    %cst_18 = arith.constant dense<0.000000e+00> : vector<2x8x128xf32>
    %24 = tpu.matmul %1, %21, %cst_18 {dimension_numbers = #tpu.dot_dimension_numbers<[2], [1], [1], [2], [0, 0, 0, 1, 1, 2], [0], [0]>} : vector<2x8x8xf32>, vector<2x8x128xf32>, vector<2x8x128xf32> -> vector<2x8x128xf32>
    "tpu.trace_stop"() : () -> ()
    %25 = arith.addf %24, %21 : vector<2x8x128xf32>
    %26 = vector.shape_cast %25 : vector<2x8x128xf32> to vector<16x128xf32>
    %cst_19 = arith.constant dense<0.000000e+00> : vector<16x128xf32>
    %27 = tpu.matmul %26, %22, %cst_19 {dimension_numbers = #tpu.dot_dimension_numbers<[1], [0], [0], [1], [0, 0, 1, 1], [], []>} : vector<16x128xf32>, vector<128x128xf32>, vector<16x128xf32> -> vector<16x128xf32>
    %28 = vector.broadcast %23 : vector<1x128xf32> to vector<16x128xf32>
    %29 = arith.addf %27, %28 : vector<16x128xf32>
    %30 = vector.shape_cast %29 : vector<16x128xf32> to vector<2x8x128xf32>
    %31 = vector.broadcast %8 : vector<2x8x1xf32> to vector<2x8x128xf32>
    %32 = arith.mulf %30, %31 : vector<2x8x128xf32>
    %cst_20 = arith.constant 0.000000e+00 : f32
    %33 = vector.broadcast %cst_20 : f32 to vector<2x8x128xf32>
    %34 = arith.maximumf %32, %33 : vector<2x8x128xf32>
    %35 = vector.extract_strided_slice %34 {offsets = [0, 0, 0], sizes = [2, 8, 32], strides = [1, 1, 1]} : vector<2x8x128xf32> to vector<2x8x32xf32>
    %c0_21 = arith.constant 0 : index
    %c0_22 = arith.constant 0 : index
    %c0_23 = arith.constant 0 : index
    %36 = vector.load %arg7[%c0_21, %c0_22, %c0_23] : memref<2x8x32xf32, #tpu.memory_space<vmem>>, vector<2x8x32xf32>
    tpu.vector_store %arg7[%c0_21, %c0_22, %c0_23], %35 {strides = array<i32>} : memref<2x8x32xf32, #tpu.memory_space<vmem>>, vector<2x8x32xf32>,
    return
  }
  func.func @transform_0(%arg0: i32) -> (i32, i32, i32) {
    %c0_i32 = arith.constant 0 : i32
    %c0_i32_0 = arith.constant 0 : i32
    %c0_i32_1 = arith.constant 0 : i32
    return %arg0, %c0_i32, %c0_i32_0 : i32, i32, i32
  }
  func.func @transform_1(%arg0: i32) -> (i32, i32, i32) {
    %c0_i32 = arith.constant 0 : i32
    %c0_i32_0 = arith.constant 0 : i32
    %c0_i32_1 = arith.constant 0 : i32
    return %arg0, %c0_i32, %c0_i32_0 : i32, i32, i32
  }
  func.func @transform_2(%arg0: i32) -> (i32, i32) {
    %c0_i32 = arith.constant 0 : i32
    %c0_i32_0 = arith.constant 0 : i32
    %c0_i32_1 = arith.constant 0 : i32
    return %c0_i32, %c0_i32_0 : i32, i32
  }
  func.func @transform_3(%arg0: i32) -> (i32, i32) {
    %c0_i32 = arith.constant 0 : i32
    %c0_i32_0 = arith.constant 0 : i32
    %c0_i32_1 = arith.constant 0 : i32
    return %c0_i32, %c0_i32_0 : i32, i32
  }
  func.func @transform_4(%arg0: i32) -> (i32, i32) {
    %c0_i32 = arith.constant 0 : i32
    %c0_i32_0 = arith.constant 0 : i32
    %c0_i32_1 = arith.constant 0 : i32
    return %c0_i32, %c0_i32_0 : i32, i32
  }
  func.func @transform_5(%arg0: i32) -> (i32, i32) {
    %c0_i32 = arith.constant 0 : i32
    %c0_i32_0 = arith.constant 0 : i32
    %c0_i32_1 = arith.constant 0 : i32
    return %c0_i32, %c0_i32_0 : i32, i32
  }
  func.func @transform_6(%arg0: i32) -> (i32, i32, i32) {
    %c0_i32 = arith.constant 0 : i32
    %c0_i32_0 = arith.constant 0 : i32
    %c0_i32_1 = arith.constant 0 : i32
    return %arg0, %c0_i32, %c0_i32_0 : i32, i32, i32
  }
}

</mosaic_0001>

<bundles_post_ra>
// kernel: tpu_custom_call.1
= control target key start
LH: loop header
LB: loop body
LE: loop exit
PB: predicated region body
PF: predicated region fallthrough
CT: control target
= control target key end

     0   :  { %11 = vsyncpa [#allocation3], 0  ;;  %s1050_s0 = inlined_call_operand.hbm [shape: bf16[2,8,8], index: 0, kind: input, shape index: {}]   ;;  %s1051_s1 = inlined_call_operand.hbm [shape: f32[2,8,32], index: 1, kind: input, shape index: {}]   ;;  %s1052_s2 = inlined_call_operand.hbm [shape: f32[32,128], index: 2, kind: input, shape index: {}]   ;;  %s1053_s3 = inlined_call_operand.vmem [shape: f32[1,128], index: 3, kind: input, shape index: {}]   ;;  %s1054_s4 = inlined_call_operand.hbm [shape: f32[128,128], index: 4, kind: input, shape index: {}]   ;;  %s1055_s5 = inlined_call_operand.vmem [shape: f32[1,128], index: 5, kind: input, shape index: {}]   ;;  %s1056_s6 = inlined_call_operand.hbm [shape: f32[2,8,32], index: 6, kind: output, shape index: {}]  }
   0x1   :  { %12 = vsyncpa [#allocation6], 0 }
   0x2   :  { %13 = vsyncpa [#allocation9], 0 }
   0x3   :  { %14 = vsyncpa [#allocation4], 0  ;;  %s887_s21 = smov [#allocation5]   ;;  %s769_s25 = scalar_lea.hbm %s1051_s1, 256 }
   0x4   :  { %s32_s22 = sshll.u32 %s887_s21, 4  ;;  %p770_p0 = scmp.ne.s32.totalorder %s1051_s1, %s769_s25  ;;  %s33_s22 = int_to_ptr.vmem [resolvable:$true] %s32_s22 }
   0x5   :  { %p773_p1 = scmp.lt.u32.totalorder %s769_s25, %s1051_s1 }
   0x7   :  { %p775_p2 = pnand %p773_p1, %p770_p0 }
   0x9   :  { %778 = shalt.err (!%p775_p2)
}
   0xa   :  { %s779_s30 = scalar_lea.vmem %s33_s22, 256  ;;  %p784_p4 = scmp.lt.s32.totalorder %s33_s22, %s33_s22 }
   0xb   :  { %p780_p3 = scmp.ne.s32.totalorder %s33_s22, %s779_s30  ;;  %p785_p5 = scmp.lt.s32.totalorder %s779_s30, %s779_s30 }
   0xd   :  { %p786_p6 = por %p785_p5, %p784_p4 }
   0xf   :  { %p787_p7 = pnand %p786_p6, %p780_p3 }
  0x11   :  { %790 = shalt.err (!%p787_p7)
}
  0x12   :  { %s888_s7 = smov 128   ;;  %s889_s8 = smov 8  }
  0x13   :  { %38 = dma.hbm_to_vmem [thread:$0]  %s1051_s1, 256, %s33_s22, [#allocation6], %s888_s7, %s888_s7, %s889_s8  }
  0x14   :  { %s890_s11 = smov [#allocation2]   ;;  %s791_s15 = scalar_lea.hbm %s1050_s0, 128 }
  0x15   :  { %s20_s12 = sshll.u32 %s890_s11, 4  ;;  %p792_p8 = scmp.ne.s32.totalorder %s1050_s0, %s791_s15  ;;  %s21_s12 = int_to_ptr.vmem [resolvable:$true] %s20_s12 }
  0x16   :  { %p795_p9 = scmp.lt.u32.totalorder %s791_s15, %s1050_s0 }
  0x18   :  { %p797_p10 = pnand %p795_p9, %p792_p8 }
  0x1a   :  { %800 = shalt.err (!%p797_p10)
}
  0x1b   :  { %s801_s20 = scalar_lea.vmem %s21_s12, 128  ;;  %p806_p12 = scmp.lt.s32.totalorder %s21_s12, %s21_s12 }
  0x1c   :  { %p802_p11 = scmp.ne.s32.totalorder %s21_s12, %s801_s20  ;;  %p807_p13 = scmp.lt.s32.totalorder %s801_s20, %s801_s20 }
  0x1e   :  { %p808_p0 = por %p807_p13, %p806_p12 }
  0x20   :  { %p809_p1 = pnand %p808_p0, %p802_p11 }
  0x22   :  { %812 = shalt.err (!%p809_p1)
}
  0x23   :  { %s891_s1 = smov 64   ;;  %s892_s21 = smov 4  }
  0x24   :  { %26 = dma.hbm_to_vmem [thread:$0]  %s1050_s0, 128, %s21_s12, [#allocation3], %s891_s1, %s891_s1, %s892_s21  }
  0x25   :  { %s893_s24 = smov [#allocation7]   ;;  %s894_s26 = smov [#allocation8]  }
  0x26   :  { %s44_s25 = sshll.u32 %s893_s24, 4  ;;  %s58_s27 = sshll.u32 %s894_s26, 4  ;;  %s45_s25 = int_to_ptr.vmem [resolvable:$true] %s44_s25  ;;  %s960_s27 = int_to_ptr.vmem [resolvable:$true] %s58_s27 }
  0x27   :  { %s813_s30 = scalar_lea.hbm %s1052_s2, 512 }
  0x28   :  { %p814_p2 = scmp.ne.s32.totalorder %s1052_s2, %s813_s30  ;;  %p817_p3 = scmp.lt.u32.totalorder %s813_s30, %s1052_s2 }
  0x2a   :  { %p819_p4 = pnand %p817_p3, %p814_p2 }
  0x2c   :  { %822 = shalt.err (!%p819_p4)
}
  0x2d   :  { %s823_s0 = scalar_lea.vmem %s45_s25, 512  ;;  %p828_p6 = scmp.lt.s32.totalorder %s45_s25, %s45_s25 }
  0x2e   :  { %p824_p5 = scmp.ne.s32.totalorder %s45_s25, %s823_s0  ;;  %p829_p7 = scmp.lt.s32.totalorder %s823_s0, %s823_s0 }
  0x30   :  { %p830_p8 = por %p829_p7, %p828_p6 }
  0x32   :  { %p831_p9 = pnand %p830_p8, %p824_p5 }
  0x34   :  { %834 = shalt.err (!%p831_p9)
}
  0x35   :  { %50 = dma.hbm_to_vmem [thread:$0]  %s1052_s2, 512, %s45_s25, [#allocation6], %s888_s7, %s888_s7, %s889_s8  }
  0x36   :  { %s835_s17 = scalar_lea.hbm %s1054_s4, 2048 }
  0x37   :  { %p836_p10 = scmp.ne.s32.totalorder %s1054_s4, %s835_s17  ;;  %p839_p11 = scmp.lt.u32.totalorder %s835_s17, %s1054_s4 }
  0x39   :  { %p841_p12 = pnand %p839_p11, %p836_p10 }
  0x3b   :  { %844 = shalt.err (!%p841_p12)
}
  0x3c   :  { %s845_s21 = scalar_lea.vmem %s960_s27, 2048  ;;  %p850_p0 = scmp.lt.s32.totalorder %s960_s27, %s960_s27 }
  0x3d   :  { %p846_p13 = scmp.ne.s32.totalorder %s960_s27, %s845_s21  ;;  %p851_p1 = scmp.lt.s32.totalorder %s845_s21, %s845_s21 }
  0x3f   :  { %p852_p2 = por %p851_p1, %p850_p0 }
  0x41   :  { %p853_p3 = pnand %p852_p2, %p846_p13 }
  0x43   :  { %856 = shalt.err (!%p853_p3)
}
  0x44   :  { %64 = dma.hbm_to_vmem [thread:$0]  %s1054_s4, 2048, %s960_s27, [#allocation9], %s888_s7, %s888_s7, %s889_s8  }
  0x45   :  { %879 = dma.done.wait [#allocation3], 128  }
  0x46   :  { %880 = vsyncadd [#allocation3], 4294967168 }
  0x47   :  { %881 = dma.done.wait [#allocation6], 768  }
  0x48   :  { %882 = vsyncadd [#allocation6], 4294966528 }
  0x49   :  { %883 = dma.done.wait [#allocation9], 2048  }
  0x4a   :  { %884 = vsyncadd [#allocation9], 4294965248  ;;  %v895_v0 = vmov 0.0   ;;  %vm896_vm0 = vmmov 0   ;;  %v83_v1 = vld [vmem:[#allocation5] sm:$0xff]  ;;  %v613_v2 = vld [vmem:[#allocation2] sm:$0xff]  }
  0x4b   :  { %648 = vmatprep.subr.mxu1 %v895_v0  ;;  %650 = vmatprep.mubr.msk.f32.mxu1 %vm896_vm0, %v895_v0  ;;  %vm85_vm1 = vcmask 64512   ;;  %v1000_v3 = vunpack.c.l.bf16 %v613_v2  ;;  %v84_v4 = vld [vmem:[#allocation5 + $0x8] sm:$0xff]  ;;  %v98_v5 = vld [vmem:[#allocation7] sm:$0xff]  ;;  %v99_v6 = vld [vmem:[#allocation7 + $0x8] sm:$0xff]  ;;  %v1003_v8 = vunpack.c.h.bf16 %v613_v2  ;;  %vm255_vm2 = vcmask 261120   ;;  %s897_s25 = smov [#allocation10]  }
  0x4c   :  { %649 = vmatpush3.msra.mxu1 %v83_v1  ;;  %v714_v7 = vpack.c.bf16 %v99_v6, %v98_v5  ;;  %v100_v9 = vld [vmem:[#allocation7 + $0x10] sm:$0xff]  ;;  %v101_v10 = vld [vmem:[#allocation7 + $0x18] sm:$0xff]  ;;  %v341_v20 = vld [vmem:[#allocation8] sm:$0xff]  ;;  %s590_s26 = sshll.u32 %s897_s25, 4  ;;  %s591_s26 = int_to_ptr.vmem [resolvable:$true] %s590_s26 }
  0x4d   :  { %653 = vmatprep.subr.mxu1 %v895_v0  ;;  %651 = vmatmul.mubr.msk.f32.vlgmr.msra.gmra.mrb[0].mxu1 %vm85_vm1, %v1000_v3  ;;  %v718_v11 = vpack.c.bf16 %v101_v10, %v100_v9  ;;  %v86_v12 = vsel %vm85_vm1, %v1000_v3, 0.0  ;;  %v89_v13 = vsel %vm85_vm1, %v1003_v8, 0.0  ;;  %v342_v21 = vld [vmem:[#allocation8 + $0x8] sm:$0xff]  ;;  %v343_v22 = vld [vmem:[#allocation8 + $0x10] sm:$0xff]  ;;  %v344_v24 = vld [vmem:[#allocation8 + $0x18] sm:$0xff]  ;;  %s857_s27 = scalar_lea.vmem %s591_s26, 256  ;;  %p862_p5 = scmp.lt.s32.totalorder %s591_s26, %s591_s26 }
  0x4e   :  { %654 = vmatpush3.msra.mxu1 %v84_v4  ;;  %655 = vmatprep.mubr.msk.f32.mxu1 %vm896_vm0, %v895_v0  ;;  %v722_v23 = vpack.c.bf16 %v342_v21, %v341_v20  ;;  %v726_v25 = vpack.c.bf16 %v344_v24, %v343_v22  ;;  %v345_v26 = vld [vmem:[#allocation8 + $0x20] sm:$0xff]  ;;  %v346_v27 = vld [vmem:[#allocation8 + $0x28] sm:$0xff]  ;;  %v347_v29 = vld [vmem:[#allocation8 + $0x30] sm:$0xff]  ;;  %p858_p4 = scmp.ne.s32.totalorder %s591_s26, %s857_s27  ;;  %p863_p6 = scmp.lt.s32.totalorder %s857_s27, %s857_s27 }
  0x4f   :  { %715 = vmatprep.subr.bf16.mxu1 %v714_v7  ;;  %87 = vadd.xlane.f32.xlu0 %v86_v12  ;;  %v730_v28 = vpack.c.bf16 %v346_v27, %v345_v26  ;;  %v348_v30 = vld [vmem:[#allocation8 + $0x38] sm:$0xff]  ;;  %v349_v32 = vld [vmem:[#allocation8 + $0x40] sm:$0xff]  ;;  %v350_v33 = vld [vmem:[#allocation8 + $0x48] sm:$0xff] }
  0x50   :  { %723 = vmatprep.subr.bf16.mxu0 %v722_v23  ;;  %v734_v31 = vpack.c.bf16 %v348_v30, %v347_v29  ;;  %v738_v34 = vpack.c.bf16 %v350_v33, %v349_v32  ;;  %v351_v35 = vld [vmem:[#allocation8 + $0x50] sm:$0xff]  ;;  %v352_v36 = vld [vmem:[#allocation8 + $0x58] sm:$0xff]  ;;  %v353_v38 = vld [vmem:[#allocation8 + $0x60] sm:$0xff]  ;;  %p864_p7 = por %p863_p6, %p862_p5 }
  0x51   :  { %656 = vmatmul.mubr.msk.f32.vlgmr.msra.gmra.mrb[2].mxu1 %vm85_vm1, %v1003_v8  ;;  %725 = vmatpush3.bf16.msra.mxu0 %v722_v23  ;;  %v742_v37 = vpack.c.bf16 %v352_v36, %v351_v35  ;;  %v354_v39 = vld [vmem:[#allocation8 + $0x68] sm:$0xff]  ;;  %v355_v56 = vld [vmem:[#allocation8 + $0x70] sm:$0xff]  ;;  %v356_v57 = vld [vmem:[#allocation8 + $0x78] sm:$0xff] }
  0x52   :  { %717 = vmatpush3.bf16.msra.mxu1 %v714_v7  ;;  %727 = vmatprep.subr.bf16.mxu0 %v726_v25  ;;  %v746_v40 = vpack.c.bf16 %v354_v39, %v353_v38  ;;  %v606_v45 = vld [vmem:[%s1053_s3] ss:$0 sm:$0xff]  ;;  %v750_v58 = vpack.c.bf16 %v356_v57, %v355_v56  ;;  %p865_p8 = pnand %p864_p7, %p858_p4 }
  0x53   :  { %719 = vmatprep.subr.bf16.mxu1 %v718_v11  ;;  %90 = vadd.xlane.f32.xlu0 %v89_v13 }
  0x55   :  { %729 = vmatpush3.bf16.msra.mxu0 %v726_v25 }
  0x56   :  { %721 = vmatpush3.bf16.msra.mxu1 %v718_v11  ;;  %731 = vmatprep.subr.bf16.mxu0 %v730_v28 }
  0x57   :  { %669 = vmatprep.subr.mxu1 %v895_v0 }
  0x59   :  { %733 = vmatpush3.bf16.msra.mxu0 %v730_v28 }
  0x5a   :  { %735 = vmatprep.subr.bf16.mxu0 %v734_v31 }
  0x5d   :  { %737 = vmatpush3.bf16.msra.mxu0 %v734_v31 }
  0x5e   :  { %739 = vmatprep.subr.bf16.mxu0 %v738_v34 }
  0x61   :  { %741 = vmatpush3.bf16.msra.mxu0 %v738_v34 }
  0x62   :  { %743 = vmatprep.subr.bf16.mxu0 %v742_v37 }
  0x65   :  { %745 = vmatpush3.bf16.msra.mxu0 %v742_v37 }
  0x66   :  { %747 = vmatprep.subr.bf16.mxu0 %v746_v40 }
  0x69   :  { %749 = vmatpush3.bf16.msra.mxu0 %v746_v40 }
  0x6a   :  { %751 = vmatprep.subr.bf16.mxu0 %v750_v58 }
  0x6d   :  { %753 = vmatpush3.bf16.msra.mxu0 %v750_v58 }
  0xdc   :  { %v88_v41 = vpop.xlane.xlu0 %87 }
  0xdd   :  { %v92_v43 = vadd.f32 1.0, %v88_v41 }
  0xdf   :  { %765 = vrcp.f32 %v92_v43 }
  0xe0   :  { %v91_v42 = vpop.xlane.xlu0 %90 }
  0xe1   :  { %v93_v44 = vadd.f32 1.0, %v91_v42 }
  0xe3   :  { %767 = vrcp.f32 %v93_v44 }
  0xe9   :  { %v766_v46 = vpop.eup %765 }
  0xed   :  { %v768_v48 = vpop.eup %767 }
 0x120   :  { %v172_v14 = vpop.f32.mrb[0].mxu1 }
 0x121   :  { %v173_v15 = vadd.f32 %v172_v14, %v83_v1  ;;  %v652_v16 = vpop.f32.mrb[1].mxu1 }
 0x123   :  { %666 = vmatprep.mubr.msk.f32.mxu1 %vm255_vm2, %v173_v15 }
 0x124   :  { %v245_v17 = vpop.f32.mrb[2].mxu1 }
 0x125   :  { %v246_v18 = vadd.f32 %v245_v17, %v84_v4  ;;  %v657_v19 = vpop.f32.mrb[3].mxu1 }
 0x127   :  { %667 = vmatmul.mubr.msk.f32.vlgmr.msra.gmra.mrb[4].mxu1 %vm255_vm2, %v246_v18 }
 0x128   :  { %671 = vmatprep.mubr.msk.f32.mxu1 %vm896_vm0, %v895_v0 }
 0x1fa   :  { %v668_v47 = vpop.f32.mrb[4].mxu1 }
 0x1fb   :  { %v334_v49 = vadd.f32 %v668_v47, %v606_v45  ;;  %v328_v50 = vpop.f32.mrb[5].mxu1 }
 0x1fc   :  { %v329_v51 = vadd.f32 %v606_v45, %v328_v50 }
 0x1fd   :  { %v338_v52 = vmul.f32 %v768_v48, %v334_v49 }
 0x1fe   :  { %v337_v53 = vmul.f32 %v766_v46, %v329_v51 }
 0x1ff   :  { %v340_v55 = vmax.f32 %v338_v52, 0.0 }
 0x200   :  { %v339_v54 = vmax.f32 %v337_v53, 0.0 }
 0x202   :  { %670 = vmatpush3.msra.mxu1 %v339_v54 }
 0x203   :  { %672 = vmatmul.mubr.msk.f32.vlgmr.msra.gmra.mrb[6].mxu1 %vm85_vm1, %v1000_v3  ;;  %674 = vmatprep.subr.mxu1 %v895_v0 }
 0x204   :  { %675 = vmatpush3.msra.mxu1 %v340_v55  ;;  %676 = vmatprep.mubr.msk.f32.mxu1 %vm896_vm0, %v895_v0  ;;  %v611_v0 = vld [vmem:[%s1055_s5] ss:$0 sm:$0xff] }
 0x207   :  { %677 = vmatmul.mubr.msk.f32.vlgmr.msra.gmra.mrb[8].mxu1 %vm85_vm1, %v1003_v8 }
 0x2d6   :  { %v424_v59 = vpop.f32.mrb[6].mxu1 }
 0x2d7   :  { %v673_v60 = vpop.f32.mrb[7].mxu1  ;;  %v425_v61 = vadd.f32 %v424_v59, %v339_v54 }
 0x2d9   :  { %711 = vmatprep.mubr.f32.mxu0 %v425_v61 }
 0x2da   :  { %v494_v62 = vpop.f32.mrb[8].mxu1 }
 0x2db   :  { %v495_v63 = vadd.f32 %v494_v62, %v340_v55  ;;  %v678_v1 = vpop.f32.mrb[9].mxu1 }
 0x2dd   :  { %712 = vmatmul.mubr.f32.vlgmr.msra.gmra.mrb[0].mxu0 %v495_v63 }
 0x3b0   :  { %v713_v2 = vpop.f32.mrb[0].mxu0 }
 0x3b1   :  { %v576_v3 = vadd.f32 %v713_v2, %v611_v0  ;;  %v570_v4 = vpop.f32.mrb[1].mxu0 }
 0x3b2   :  { %v571_v5 = vadd.f32 %v611_v0, %v570_v4 }
 0x3b3   :  { %v580_v6 = vmul.f32 %v768_v48, %v576_v3 }
 0x3b4   :  { %v579_v7 = vmul.f32 %v766_v46, %v571_v5 }
 0x3b5   :  { %v582_v8 = vmax.f32 %v580_v6, 0.0 }
 0x3b6   :  { %v581_v9 = vmax.f32 %v579_v7, 0.0 }
 0x3b7   :  { %584 = vst.msk [vmem:[#allocation10 + $0x8] sm:$0xff] %vm255_vm2, %v582_v8 }
 0x3b8   :  { %583 = vst.msk [vmem:[#allocation10] sm:$0xff] %vm255_vm2, %v581_v9 }
 0x3b9   :  { %868 = shalt.err (!%p865_p8)
}
 0x3ba   :  { %s869_s29 = scalar_lea.hbm %s1056_s6, 256 }
 0x3bb   :  { %p870_p9 = scmp.ne.s32.totalorder %s1056_s6, %s869_s29  ;;  %p873_p10 = scmp.lt.u32.totalorder %s869_s29, %s1056_s6 }
 0x3bd   :  { %p875_p11 = pnand %p873_p10, %p870_p9 }
 0x3bf   :  { %878 = shalt.err (!%p875_p11)
}
 0x3c0   :  { %596 = dma.vmem_to_hbm [thread:$0]  %s591_s26, 256, %s1056_s6, [#allocation4], %s888_s7, %s888_s7, %s889_s8  }
 0x3c1   :  { %885 = dma.done.wait [#allocation4], 256  }
 0x3c2   :  { %886 = vsyncadd [#allocation4], 4294967040 }
 0x3c3   :  { %600 = vsyncpa [#allocation3], 1 }
 0x3c4   :  { %601 = vsyncpa [#allocation6], 1 }
 0x3c5   :  { %602 = vsyncpa [#allocation9], 1 }
 0x3c6   :  { %603 = vsyncpa [#allocation4], 1 }

</bundles_post_ra>
